<compile_context>
chip_gen: v6e
topology: v6e:2x2x1
jax: 0.10.0
libtpu: 0.0.40
codegen_flags: <defaults>
</compile_context>

<pallas_src>
import functools

import jax
import jax.numpy as jnp
from jax.experimental import pallas as pl
from jax.experimental.pallas import tpu as pltpu


def _rmsnorm_kernel(x_ref, w_ref, o_ref, *, eps: float):
    # x_ref: (tile_rows, d_model) block; w_ref: (1, d_model); o_ref like x_ref.
    x = x_ref[...].astype(jnp.float32)
    w = w_ref[...].astype(jnp.float32)            # broadcasts over rows
    ms = jnp.mean(x * x, axis=-1, keepdims=True)  # XLU cross-lane reduce
    inv_rms = jax.lax.rsqrt(ms + eps)             # EUP transcendental
    o_ref[...] = ((x * inv_rms) * w).astype(o_ref.dtype)


def _pick_tile_rows(n_rows: int, d_model: int, dtype, vmem_budget_bytes: int) -> int:
    """Largest dtype-aligned row tile whose VMEM footprint fits the budget."""
    itemsize = jnp.dtype(dtype).itemsize
    if itemsize >= 4:
        min_rows = 8      # f32 sublane granularity
    elif itemsize == 2:
        min_rows = 16     # bf16/f16 pack 2 rows per sublane
    else:
        min_rows = 32     # int8 / fp8 pack 4 rows per sublane

    # Per-row VMEM cost: double-buffered input + output block (itemsize each)
    # plus ~3 f32-sized temporaries for the live block (x_f32, product, result).
    bytes_per_row = (2 * 2 * itemsize + 3 * 4) * d_model
    tile = vmem_budget_bytes // max(bytes_per_row, 1)
    tile = (tile // min_rows) * min_rows
    tile = max(min_rows, tile)
    tile = min(tile, 1024)  # ~85%+ of HBM BW is already reached by 512-1024 rows

    # No point making the block bigger than the (min_rows-rounded) row count.
    n_rows_up = ((n_rows + min_rows - 1) // min_rows) * min_rows
    tile = max(min_rows, min(tile, n_rows_up))
    return tile


def rmsnorm(x: jax.Array, weight: jax.Array, eps: float = 1e-6,
            tile_rows: int | None = None) -> jax.Array:
    """RMSNorm over the last axis of x, matching the PyTorch module."""
    in_dtype = x.dtype
    d_model = x.shape[-1]
    lead_shape = x.shape[:-1]
    n_rows = 1
    for s in lead_shape:
        n_rows *= s

    x2d = x.reshape(n_rows, d_model)
    w2d = weight.reshape(1, d_model)

    # Budget chosen so the pipeline fits comfortably inside v7x's 64 MiB VMEM
    # (and trivially inside v5e/v6e's 128 MiB).
    vmem_budget_bytes = 40 * 1024 * 1024
    if tile_rows is None:
        tile_rows = _pick_tile_rows(n_rows, d_model, in_dtype, vmem_budget_bytes)

    grid = (pl.cdiv(n_rows, tile_rows),)  # partial last block masked by Pallas

    kernel = functools.partial(_rmsnorm_kernel, eps=eps)

    out2d = pl.pallas_call(
        kernel,
        out_shape=jax.ShapeDtypeStruct((n_rows, d_model), in_dtype),
        grid_spec=pltpu.PrefetchScalarGridSpec(
            num_scalar_prefetch=0,
            grid=grid,
            in_specs=[
                pl.BlockSpec((tile_rows, d_model), lambda i: (i, 0)),
                pl.BlockSpec((1, d_model), lambda i: (0, 0)),
            ],
            out_specs=pl.BlockSpec((tile_rows, d_model), lambda i: (i, 0)),
        ),
        compiler_params=pltpu.CompilerParams(
            dimension_semantics=("parallel",),      # shards rows across v7x's 2 TCs
            vmem_limit_bytes=64 * 1024 * 1024,      # raise scoped VMEM for big blocks
        ),
    )(x2d, w2d)

    return out2d.reshape(*lead_shape, d_model)


def rmsnorm_ref(x, weight, eps=1e-6):
    in_dtype = x.dtype
    xf = x.astype(jnp.float32)
    rms = jax.lax.rsqrt(jnp.mean(xf * xf, axis=-1, keepdims=True) + eps)
    return (weight.astype(jnp.float32) * (xf * rms)).astype(in_dtype)


if __name__ == "__main__":
    key = jax.random.PRNGKey(0)

    # Main check: small, lane-dense shape (d_model multiple of 128).
    batch, seq, d_model = 2, 8, 128
    x = jax.random.normal(key, (batch, seq, d_model), dtype=jnp.float32)
    weight = jnp.ones((d_model,), dtype=jnp.float32)  # module init: ones(d_model)

    out = rmsnorm(x, weight, eps=1e-6)
    out = jax.block_until_ready(out)
    ref = rmsnorm_ref(x, weight, eps=1e-6)
    assert out.shape == x.shape and out.dtype == x.dtype
    assert jnp.allclose(out, ref, atol=1e-5, rtol=1e-5), "mismatch vs reference"

    # Second check: row count NOT a multiple of the tile -> exercises the
    # cdiv grid / masked partial trailing block (no host-side padding).
    key2 = jax.random.PRNGKey(1)
    x2 = jax.random.normal(key2, (3, 5, d_model), dtype=jnp.float32)
    w2 = jax.random.normal(jax.random.PRNGKey(2), (d_model,), dtype=jnp.float32)
    out2 = jax.block_until_ready(rmsnorm(x2, w2, eps=1e-6))
    ref2 = rmsnorm_ref(x2, w2, eps=1e-6)
    assert out2.shape == x2.shape and out2.dtype == x2.dtype
    assert jnp.allclose(out2, ref2, atol=1e-5, rtol=1e-5), "partial-block mismatch"

    print("KERNEL_OK")
</pallas_src>

<mosaic_0001>
module attributes {stable_mosaic.version = 11 : i64} {
  func.func @_rmsnorm_kernel(%arg0: i32, %arg1: memref<16x128xf32, #tpu.memory_space<vmem>>, %arg2: memref<1x128xf32, #tpu.memory_space<vmem>>, %arg3: memref<16x128xf32, #tpu.memory_space<vmem>>) attributes {dimension_semantics = [#tpu.dimension_semantics<parallel>], iteration_bounds = array<i64: 1>, scalar_prefetch = 0 : i64, scratch_operands = 0 : i64, tpu.core_type = #tpu.core_type<tc>, window_params = [{transform_indices = @transform_0, window_bounds = array<i64: 16, 128>}, {pipeline_mode = #tpu.pipeline_mode<synchronous>, transform_indices = @transform_1, window_bounds = array<i64: 1, 128>}, {transform_indices = @transform_2, window_bounds = array<i64: 16, 128>}]} {
    %c0 = arith.constant 0 : index
    %c0_0 = arith.constant 0 : index
    %0 = vector.load %arg1[%c0, %c0_0] : memref<16x128xf32, #tpu.memory_space<vmem>>, vector<16x128xf32>
    %c0_1 = arith.constant 0 : index
    %c0_2 = arith.constant 0 : index
    %1 = vector.load %arg2[%c0_1, %c0_2] : memref<1x128xf32, #tpu.memory_space<vmem>>, vector<1x128xf32>
    %2 = arith.mulf %0, %0 : vector<16x128xf32>
    %cst = arith.constant dense<0.000000e+00> : vector<16xf32>
    %3 = vector.multi_reduction <add>, %2, %cst [1] : vector<16x128xf32> to vector<16xf32>
    %4 = vector.shape_cast %3 : vector<16xf32> to vector<16x1xf32>
    %cst_3 = arith.constant 1.280000e+02 : f32
    %5 = vector.broadcast %cst_3 : f32 to vector<16x1xf32>
    %6 = arith.divf %4, %5 : vector<16x1xf32>
    %cst_4 = arith.constant 9.99999997E-7 : f32
    %7 = vector.broadcast %cst_4 : f32 to vector<16x1xf32>
    %8 = arith.addf %6, %7 : vector<16x1xf32>
    %9 = math.rsqrt %8 : vector<16x1xf32>
    %10 = vector.broadcast %9 : vector<16x1xf32> to vector<16x128xf32>
    %11 = arith.mulf %0, %10 : vector<16x128xf32>
    %12 = vector.broadcast %1 : vector<1x128xf32> to vector<16x128xf32>
    %13 = arith.mulf %11, %12 : vector<16x128xf32>
    %c0_5 = arith.constant 0 : index
    %c0_6 = arith.constant 0 : index
    %14 = vector.load %arg3[%c0_5, %c0_6] : memref<16x128xf32, #tpu.memory_space<vmem>>, vector<16x128xf32>
    tpu.vector_store %arg3[%c0_5, %c0_6], %13 {strides = array<i32>} : memref<16x128xf32, #tpu.memory_space<vmem>>, vector<16x128xf32>,
    return
  }
  func.func @transform_0(%arg0: i32) -> (i32, i32) {
    %c0_i32 = arith.constant 0 : i32
    %c0_i32_0 = arith.constant 0 : i32
    return %arg0, %c0_i32 : i32, i32
  }
  func.func @transform_1(%arg0: i32) -> (i32, i32) {
    %c0_i32 = arith.constant 0 : i32
    %c0_i32_0 = arith.constant 0 : i32
    %c0_i32_1 = arith.constant 0 : i32
    return %c0_i32, %c0_i32_0 : i32, i32
  }
  func.func @transform_2(%arg0: i32) -> (i32, i32) {
    %c0_i32 = arith.constant 0 : i32
    %c0_i32_0 = arith.constant 0 : i32
    return %arg0, %c0_i32 : i32, i32
  }
}

</mosaic_0001>

<bundles_post_ra>
// kernel: tpu_custom_call.1
= control target key start
LH: loop header
LB: loop body
LE: loop exit
PB: predicated region body
PF: predicated region fallthrough
CT: control target
= control target key end

     0   :  { %7 = vsyncpa [#allocation3], 0  ;;  %s158_s0 = inlined_call_operand.hbm [shape: f32[16,128], index: 0, kind: input, shape index: {}]   ;;  %s159_s1 = inlined_call_operand.vmem [shape: f32[1,128], index: 1, kind: input, shape index: {}]   ;;  %s160_s2 = inlined_call_operand.hbm [shape: f32[16,128], index: 2, kind: output, shape index: {}]  }
   0x1   :  { %8 = vsyncpa [#allocation4], 0  ;;  %s124_s9 = smov [#allocation2]  }
   0x2   :  { %s14_s10 = sshll.u32 %s124_s9, 4  ;;  %s15_s10 = int_to_ptr.vmem [resolvable:$true] %s14_s10 }
   0x3   :  { %s88_s11 = scalar_lea.vmem %s15_s10, 256  ;;  %p93_p1 = scmp.lt.s32.totalorder %s15_s10, %s15_s10 }
   0x4   :  { %p89_p0 = scmp.ne.s32.totalorder %s15_s10, %s88_s11  ;;  %p94_p2 = scmp.lt.s32.totalorder %s88_s11, %s88_s11 }
   0x6   :  { %p95_p3 = por %p94_p2, %p93_p1 }
   0x8   :  { %p96_p4 = pnand %p95_p3, %p89_p0 }
   0xa   :  { %99 = shalt.err (!%p96_p4)
}
   0xb   :  { %s125_s12 = smov 128   ;;  %s126_s13 = smov 8  }
   0xc   :  { %20 = dma.hbm_to_vmem [thread:$0]  %s158_s0, 256, %s15_s10, [#allocation3], %s125_s12, %s125_s12, %s126_s13  }
   0xd   :  { %120 = dma.done.wait [#allocation3], 256  }
   0xe   :  { %121 = vsyncadd [#allocation3], 4294967040  ;;  %v26_v0 = vld [vmem:[#allocation2] sm:$0xff]  ;;  %v27_v1 = vld [vmem:[#allocation2 + $0x8] sm:$0xff]  ;;  %s127_s0 = smov [#allocation5]  }
   0xf   :  { %v29_v2 = vmul.f32 %v26_v0, %v26_v0  ;;  %v30_v3 = vmul.f32 %v27_v1, %v27_v1  ;;  %v71_v11 = vld [vmem:[%s159_s1] ss:$0 sm:$0xff]  ;;  %s59_s18 = sshll.u32 %s127_s0, 4  ;;  %s60_s18 = int_to_ptr.vmem [resolvable:$true] %s59_s18 }
  0x10   :  { %s100_s19 = scalar_lea.vmem %s60_s18, 256  ;;  %p105_p6 = scmp.lt.s32.totalorder %s60_s18, %s60_s18 }
  0x11   :  { %31 = vadd.xlane.f32.xlu0 %v29_v2  ;;  %p101_p5 = scmp.ne.s32.totalorder %s60_s18, %s100_s19  ;;  %p106_p7 = scmp.lt.s32.totalorder %s100_s19, %s100_s19 }
  0x13   :  { %p107_p8 = por %p106_p7, %p105_p6 }
  0x15   :  { %33 = vadd.xlane.f32.xlu0 %v30_v3  ;;  %p108_p9 = pnand %p107_p8, %p101_p5 }
  0x9a   :  { %v32_v4 = vpop.xlane.xlu0 %31 }
  0x9b   :  { %v36_v5 = vmul.f32 0.0078125, %v32_v4 }
  0x9d   :  { %v38_v6 = vadd.f32 1e-06, %v36_v5 }
  0x9e   :  { %v34_v7 = vpop.xlane.xlu0 %33 }
  0x9f   :  { %76 = vrsqrt.f32 %v38_v6  ;;  %v37_v8 = vmul.f32 0.0078125, %v34_v7 }
  0xa1   :  { %v39_v9 = vadd.f32 1e-06, %v37_v8 }
  0xa3   :  { %78 = vrsqrt.f32 %v39_v9 }
  0xac   :  { %v77_v10 = vpop.eup %76 }
  0xad   :  { %v42_v12 = vmul.f32 %v77_v10, %v26_v0 }
  0xaf   :  { %v50_v13 = vmul.f32 %v71_v11, %v42_v12 }
  0xb0   :  { %v79_v14 = vpop.eup %78 }
  0xb1   :  { %v43_v15 = vmul.f32 %v79_v14, %v27_v1  ;;  %52 = vst [vmem:[#allocation5] sm:$0xff] %v50_v13 }
  0xb3   :  { %v51_v16 = vmul.f32 %v71_v11, %v43_v15 }
  0xb5   :  { %53 = vst [vmem:[#allocation5 + $0x8] sm:$0xff] %v51_v16 }
  0xb6   :  { %111 = shalt.err (!%p108_p9)
}
  0xb7   :  { %65 = dma.vmem_to_hbm [thread:$0]  %s60_s18, 256, %s160_s2, [#allocation4], %s125_s12, %s125_s12, %s126_s13  }
  0xb8   :  { %122 = dma.done.wait [#allocation4], 256  }
  0xb9   :  { %123 = vsyncadd [#allocation4], 4294967040 }
  0xba   :  { %69 = vsyncpa [#allocation3], 1 }
  0xbb   :  { %70 = vsyncpa [#allocation4], 1 }

</bundles_post_ra>
